<compile_context>
chip_gen: v7x
topology: tpu7x:2x2x1
jax: 0.10.0
libtpu: 0.0.40
codegen_flags: <defaults>
</compile_context>

<pallas_src>
import jax
import jax.numpy as jnp
from jax.experimental import pallas as pl
from jax.experimental.pallas import tpu as pltpu


def _cdiv(a: int, b: int) -> int:
    return (a + b - 1) // b


def _round_up(x: int, m: int) -> int:
    return _cdiv(x, m) * m


def _make_gce_kernel(q: float, TB: int, TC: int, C: int, num_col_tiles: int):
    inv_q = 1.0 / q
    needs_col_mask = (C % TC) != 0   # last class block overhangs the array

    def kernel(logits_ref, targets_ref, out_ref, m_sc, d_sc, g_sc):
        # logits_ref : (TB, TC)  native dtype (f32 or bf16) in VMEM
        # targets_ref: (TB, 1)   int32 in VMEM (block index constant over kc -> resident)
        # out_ref    : (1, 1, TB) float32, lane-dense row (written at last kc only)
        # m_sc/d_sc/g_sc: (TB, 1) f32 running max / running sum-exp / target logit
        kc = pl.program_id(1)

        @pl.when(kc == 0)
        def _init():
            m_sc[...] = jnp.full((TB, 1), -jnp.inf, dtype=jnp.float32)
            d_sc[...] = jnp.zeros((TB, 1), dtype=jnp.float32)
            g_sc[...] = jnp.zeros((TB, 1), dtype=jnp.float32)

        x = logits_ref[...]                                    # (TB, TC) native
        t = targets_ref[...]                                   # (TB, 1) int32
        # (1, TC) global class indices of this block; broadcast against t / xf.
        cls = kc * TC + jax.lax.broadcasted_iota(jnp.int32, (1, TC), 1)

        xf = x.astype(jnp.float32)                             # exp path needs f32
        if needs_col_mask:
            xf = jnp.where(cls < C, xf, -jnp.inf)              # mask ragged last block
            x_stats = xf
        else:
            # max / select are exact in the native dtype (halves vreg width for bf16).
            x_stats = x

        # --- online softmax statistics -------------------------------------
        m_prev = m_sc[...]
        m_blk = jnp.max(x_stats, axis=1, keepdims=True).astype(jnp.float32)
        m_new = jnp.maximum(m_prev, m_blk)
        # exp(-inf - finite) == 0 on the first step, so no special casing.
        d_sc[...] = (d_sc[...] * jnp.exp(m_prev - m_new)
                     + jnp.sum(jnp.exp(xf - m_new), axis=1, keepdims=True))
        # --- fused select-reduce gather of x[b, targets[b]] ------------------
        sel = jnp.where(cls == t, x_stats, jnp.zeros((), dtype=x_stats.dtype))
        g_sc[...] = g_sc[...] + jnp.sum(sel, axis=1, keepdims=True).astype(jnp.float32)
        m_sc[...] = m_new

        @pl.when(kc == num_col_tiles - 1)
        def _finalize():
            # log Yg = logit_t - m - log(denom);  Yg**q = exp(q * log Yg)
            log_yg = g_sc[...] - m_sc[...] - jnp.log(d_sc[...])
            loss = (1.0 - jnp.exp(q * log_yg)) * inv_q          # (TB, 1) f32
            out_ref[...] = loss.reshape(1, 1, TB)               # lane-dense store

        # TODO(synk): PyTorch raises NameError on NaN(p.mean()/Yg.mean()); there is
        # no clean in-kernel host-exception equivalent (NaN inputs give NaN loss).
        # TODO(synk): out-of-range targets give a finite (wrong) loss instead of
        # PyTorch's gather error (the select mask is simply all-false).

    return kernel


def generalized_ce_loss(logits, targets, q: float = 0.7,
                        block_batch=None, block_classes=None):
    """Pallas implementation of GeneralizedCELoss.forward.

    Args:
      logits:        (batch, num_classes) float array (f32 or bf16; fed to the
                     kernel in its native dtype — no host-side upcast or pad).
      targets:       (batch,) integer class indices.
      q:             GCE exponent.
      block_batch:   optional cap on rows per grid step.
      block_classes: optional cap on classes per grid step (forces the
                     online-softmax class split; rounded to 128).

    Returns:
      (batch,) float32 per-sample loss.
    """
    B, C = logits.shape
    itemsize = jnp.dtype(logits.dtype).itemsize

    # ---- generation-aware VMEM budget --------------------------------------
    try:
        vmem_cap = int(pltpu.get_tpu_info().vmem_capacity_bytes)
    except Exception:                      # no TPU info available (e.g. interpret)
        vmem_cap = 64 * 1024 * 1024
    # Scoped limit requested from the compiler: 64 MiB on 128 MiB parts
    # (v5e/v6e), 48 MiB on 64 MiB-per-TC v7x.
    vmem_limit = min((vmem_cap * 3) // 4, 64 * 1024 * 1024)
    # Working-set target per grid step; leave headroom for compiler temps.
    tile_budget = (vmem_limit * 13) // 20
    # VMEM bytes one logits element costs during a step:
    # 2 pipeline buffers in the native dtype + ~2 f32-sized in-kernel temporaries
    # (the f32 temps dominate for bf16 inputs, so count them explicitly).
    bytes_per_elem = 2 * itemsize + 8
    max_elems = max(tile_budget // bytes_per_elem, 16 * 128)

    # ---- class tile ----------------------------------------------------------
    if block_classes is not None:
        TC = min(_round_up(block_classes, 128), _round_up(C, 128))
    elif max_elems // C >= 128:
        TC = C                              # whole class dim fits next to a healthy TB
    else:
        # Vocab-scale C: split classes (online softmax), aim for TB ~ 256.
        TC = max(128, ((max_elems // 256) // 128) * 128)
        TC = min(TC, _round_up(C, 128))
    if TC >= C:
        TC = C
    num_col_tiles = _cdiv(C, TC)

    # ---- batch tile ----------------------------------------------------------
    TB = max_elems // max(TC, 1)
    if block_batch is not None:
        TB = min(TB, int(block_batch))
    TB = min(TB, 1024)                      # HBM pipeline saturates ~512-1024 rows
    TB = min(TB, _round_up(B, 16))          # never exceed (rounded) batch
    if B >= 256:                            # >=2 row tiles so v7x megacore splits work
        TB = min(TB, _round_up(_cdiv(B, 2), 128))
    TB = max(16, (TB // 16) * 16)           # sublane-friendly (incl. bf16 packing)
    num_row_tiles = _cdiv(B, TB)

    targets2d = targets.astype(jnp.int32).reshape(B, 1)

    out = pl.pallas_call(
        _make_gce_kernel(float(q), TB, TC, C, num_col_tiles),
        out_shape=jax.ShapeDtypeStruct((num_row_tiles, 1, TB), jnp.float32),
        grid=(num_row_tiles, num_col_tiles),
        in_specs=[
            pl.BlockSpec((TB, TC), lambda i, k: (i, k)),
            pl.BlockSpec((TB, 1), lambda i, k: (i, 0)),
        ],
        out_specs=pl.BlockSpec((1, 1, TB), lambda i, k: (i, 0, 0)),
        scratch_shapes=[
            pltpu.VMEM((TB, 1), jnp.float32),   # running max
            pltpu.VMEM((TB, 1), jnp.float32),   # running sum-exp
            pltpu.VMEM((TB, 1), jnp.float32),   # gathered target logit
        ],
        compiler_params=pltpu.CompilerParams(
            dimension_semantics=("parallel", "arbitrary"),
            vmem_limit_bytes=int(vmem_limit),
        ),
    )(logits, targets2d)

    # Lane-dense (num_row_tiles, 1, TB) -> (B,); overhang rows are dropped here.
    return out.reshape(num_row_tiles * TB)[:B]


def _reference(logits, targets, q=0.7):
    p = jax.nn.softmax(logits.astype(jnp.float32), axis=1)
    yg = jnp.take_along_axis(p, targets.reshape(-1, 1).astype(jnp.int32), axis=1)[:, 0]
    return (1.0 - yg ** q) / q


if __name__ == "__main__":
    key = jax.random.PRNGKey(0)
    k1, k2, k3, k4, k5, k6 = jax.random.split(key, 6)

    # 1) Small shape matching the module: (batch, num_classes) + (batch,).
    batch, num_classes = 8, 32
    logits = jax.random.normal(k1, (batch, num_classes), dtype=jnp.float32)
    targets = jax.random.randint(k2, (batch,), 0, num_classes, dtype=jnp.int32)
    loss = generalized_ce_loss(logits, targets, q=0.7)
    jax.block_until_ready(loss)
    ref = _reference(logits, targets, q=0.7)
    assert loss.shape == (batch,)
    assert jnp.allclose(loss, ref, atol=1e-5, rtol=1e-5), (loss, ref)

    # 2) Multi-row-tile grid, batch not a multiple of the tile (no host-side pad).
    b2, c2 = 300, 200
    logits2 = jax.random.normal(k3, (b2, c2), dtype=jnp.float32)
    targets2 = jax.random.randint(k4, (b2,), 0, c2, dtype=jnp.int32)
    loss2 = generalized_ce_loss(logits2, targets2, q=0.7)
    jax.block_until_ready(loss2)
    ref2 = _reference(logits2, targets2, q=0.7)
    assert loss2.shape == (b2,)
    assert jnp.allclose(loss2, ref2, atol=1e-5, rtol=1e-5), (loss2, ref2)

    # 3) Forced class-dim split: exercises the online-softmax reduction and the
    #    in-kernel column mask on the ragged last class block.
    b3, c3 = 64, 1000
    logits3 = jax.random.normal(k5, (b3, c3), dtype=jnp.float32)
    targets3 = jax.random.randint(k6, (b3,), 0, c3, dtype=jnp.int32)
    loss3 = generalized_ce_loss(logits3, targets3, q=0.7, block_classes=256)
    jax.block_until_ready(loss3)
    ref3 = _reference(logits3, targets3, q=0.7)
    assert loss3.shape == (b3,)
    assert jnp.allclose(loss3, ref3, atol=1e-5, rtol=1e-5), (loss3, ref3)

    # 4) bf16 logits go straight into the kernel (native-dtype HBM traffic).
    logits_bf16 = logits2.astype(jnp.bfloat16)
    loss_bf16 = generalized_ce_loss(logits_bf16, targets2, q=0.7)
    jax.block_until_ready(loss_bf16)
    ref_bf16 = _reference(logits_bf16.astype(jnp.float32), targets2, q=0.7)
    assert jnp.allclose(loss_bf16, ref_bf16, atol=1e-4, rtol=1e-4), (loss_bf16, ref_bf16)

    print("KERNEL_OK")
</pallas_src>

<mosaic_0001>
module attributes {stable_mosaic.version = 11 : i64} {
  func.func @kernel(%arg0: i32, %arg1: i32, %arg2: memref<16x32xf32, #tpu.memory_space<vmem>>, %arg3: memref<16x1xi32, #tpu.memory_space<vmem>>, %arg4: memref<1x1x16xf32, #tpu.memory_space<vmem>>, %arg5: memref<16x1xf32, #tpu.memory_space<vmem>>, %arg6: memref<16x1xf32, #tpu.memory_space<vmem>>, %arg7: memref<16x1xf32, #tpu.memory_space<vmem>>) attributes {dimension_semantics = [#tpu.dimension_semantics<parallel>, #tpu.dimension_semantics<arbitrary>], iteration_bounds = array<i64: 1, 1>, scalar_prefetch = 0 : i64, scratch_operands = 3 : i64, tpu.core_type = #tpu.core_type<tc>, window_params = [{transform_indices = @transform_0, window_bounds = array<i64: 16, 32>}, {transform_indices = @transform_1, window_bounds = array<i64: 16, 1>}, {transform_indices = @transform_2, window_bounds = array<i64: 1, 1, 16>}]} {
    %c0_i32 = arith.constant 0 : i32
    %0 = arith.cmpi eq, %arg1, %c0_i32 : i32
    %1 = arith.extui %0 : i1 to i32
    %c0_i32_0 = arith.constant 0 : i32
    %2 = arith.cmpi ne, %1, %c0_i32_0 : i32
    scf.if %2 {
      %cst_21 = arith.constant 0xFF800000 : f32
      %38 = vector.broadcast %cst_21 : f32 to vector<16x1xf32>
      %c0_22 = arith.constant 0 : index
      %c0_23 = arith.constant 0 : index
      %39 = vector.load %arg5[%c0_22, %c0_23] : memref<16x1xf32, #tpu.memory_space<vmem>>, vector<16x1xf32>
      tpu.vector_store %arg5[%c0_22, %c0_23], %38 {strides = array<i32>} : memref<16x1xf32, #tpu.memory_space<vmem>>, vector<16x1xf32>,
      %cst_24 = arith.constant 0.000000e+00 : f32
      %40 = vector.broadcast %cst_24 : f32 to vector<16x1xf32>
      %c0_25 = arith.constant 0 : index
      %c0_26 = arith.constant 0 : index
      %41 = vector.load %arg6[%c0_25, %c0_26] : memref<16x1xf32, #tpu.memory_space<vmem>>, vector<16x1xf32>
      tpu.vector_store %arg6[%c0_25, %c0_26], %40 {strides = array<i32>} : memref<16x1xf32, #tpu.memory_space<vmem>>, vector<16x1xf32>,
      %cst_27 = arith.constant 0.000000e+00 : f32
      %42 = vector.broadcast %cst_27 : f32 to vector<16x1xf32>
      %c0_28 = arith.constant 0 : index
      %c0_29 = arith.constant 0 : index
      %43 = vector.load %arg7[%c0_28, %c0_29] : memref<16x1xf32, #tpu.memory_space<vmem>>, vector<16x1xf32>
      tpu.vector_store %arg7[%c0_28, %c0_29], %42 {strides = array<i32>} : memref<16x1xf32, #tpu.memory_space<vmem>>, vector<16x1xf32>,
    } else {
    }
    %c0 = arith.constant 0 : index
    %c0_1 = arith.constant 0 : index
    %3 = vector.load %arg2[%c0, %c0_1] : memref<16x32xf32, #tpu.memory_space<vmem>>, vector<16x32xf32>
    %c0_2 = arith.constant 0 : index
    %c0_3 = arith.constant 0 : index
    %4 = vector.load %arg3[%c0_2, %c0_3] : memref<16x1xi32, #tpu.memory_space<vmem>>, vector<16x1xi32>
    %c32_i32 = arith.constant 32 : i32
    %5 = arith.muli %arg1, %c32_i32 : i32
    %6 = tpu.iota {dimensions = array<i32: 1>} : vector<1x32xi32>
    %7 = vector.broadcast %5 : i32 to vector<1x32xi32>
    %8 = arith.addi %7, %6 : vector<1x32xi32>
    %c0_4 = arith.constant 0 : index
    %c0_5 = arith.constant 0 : index
    %9 = vector.load %arg5[%c0_4, %c0_5] : memref<16x1xf32, #tpu.memory_space<vmem>>, vector<16x1xf32>
    %cst = arith.constant dense<0xFF800000> : vector<16xf32>
    %10 = vector.multi_reduction <maximumf>, %3, %cst [1] : vector<16x32xf32> to vector<16xf32>
    %11 = vector.shape_cast %10 : vector<16xf32> to vector<16x1xf32>
    %12 = arith.maximumf %9, %11 : vector<16x1xf32>
    %c0_6 = arith.constant 0 : index
    %c0_7 = arith.constant 0 : index
    %13 = vector.load %arg6[%c0_6, %c0_7] : memref<16x1xf32, #tpu.memory_space<vmem>>, vector<16x1xf32>
    %14 = arith.subf %9, %12 : vector<16x1xf32>
    %15 = math.exp %14 : vector<16x1xf32>
    %16 = arith.mulf %13, %15 : vector<16x1xf32>
    %17 = vector.broadcast %12 : vector<16x1xf32> to vector<16x32xf32>
    %18 = arith.subf %3, %17 : vector<16x32xf32>
    %19 = math.exp %18 : vector<16x32xf32>
    %cst_8 = arith.constant dense<0.000000e+00> : vector<16xf32>
    %20 = vector.multi_reduction <add>, %19, %cst_8 [1] : vector<16x32xf32> to vector<16xf32>
    %21 = vector.shape_cast %20 : vector<16xf32> to vector<16x1xf32>
    %22 = arith.addf %16, %21 : vector<16x1xf32>
    %c0_9 = arith.constant 0 : index
    %c0_10 = arith.constant 0 : index
    %23 = vector.load %arg6[%c0_9, %c0_10] : memref<16x1xf32, #tpu.memory_space<vmem>>, vector<16x1xf32>
    tpu.vector_store %arg6[%c0_9, %c0_10], %22 {strides = array<i32>} : memref<16x1xf32, #tpu.memory_space<vmem>>, vector<16x1xf32>,
    %24 = vector.broadcast %8 : vector<1x32xi32> to vector<16x32xi32>
    %25 = vector.broadcast %4 : vector<16x1xi32> to vector<16x32xi32>
    %26 = arith.cmpi eq, %24, %25 : vector<16x32xi32>
    %cst_11 = arith.constant 0.000000e+00 : f32
    %27 = vector.broadcast %cst_11 : f32 to vector<16x32xf32>
    %28 = arith.select %26, %3, %27 : vector<16x32xi1>, vector<16x32xf32>
    %c0_12 = arith.constant 0 : index
    %c0_13 = arith.constant 0 : index
    %29 = vector.load %arg7[%c0_12, %c0_13] : memref<16x1xf32, #tpu.memory_space<vmem>>, vector<16x1xf32>
    %cst_14 = arith.constant dense<0.000000e+00> : vector<16xf32>
    %30 = vector.multi_reduction <add>, %28, %cst_14 [1] : vector<16x32xf32> to vector<16xf32>
    %31 = vector.shape_cast %30 : vector<16xf32> to vector<16x1xf32>
    %32 = arith.addf %29, %31 : vector<16x1xf32>
    %c0_15 = arith.constant 0 : index
    %c0_16 = arith.constant 0 : index
    %33 = vector.load %arg7[%c0_15, %c0_16] : memref<16x1xf32, #tpu.memory_space<vmem>>, vector<16x1xf32>
    tpu.vector_store %arg7[%c0_15, %c0_16], %32 {strides = array<i32>} : memref<16x1xf32, #tpu.memory_space<vmem>>, vector<16x1xf32>,
    %c0_17 = arith.constant 0 : index
    %c0_18 = arith.constant 0 : index
    %34 = vector.load %arg5[%c0_17, %c0_18] : memref<16x1xf32, #tpu.memory_space<vmem>>, vector<16x1xf32>
    tpu.vector_store %arg5[%c0_17, %c0_18], %12 {strides = array<i32>} : memref<16x1xf32, #tpu.memory_space<vmem>>, vector<16x1xf32>,
    %c0_i32_19 = arith.constant 0 : i32
    %35 = arith.cmpi eq, %arg1, %c0_i32_19 : i32
    %36 = arith.extui %35 : i1 to i32
    %c0_i32_20 = arith.constant 0 : i32
    %37 = arith.cmpi ne, %36, %c0_i32_20 : i32
    scf.if %37 {
      %c0_21 = arith.constant 0 : index
      %c0_22 = arith.constant 0 : index
      %38 = vector.load %arg7[%c0_21, %c0_22] : memref<16x1xf32, #tpu.memory_space<vmem>>, vector<16x1xf32>
      %c0_23 = arith.constant 0 : index
      %c0_24 = arith.constant 0 : index
      %39 = vector.load %arg5[%c0_23, %c0_24] : memref<16x1xf32, #tpu.memory_space<vmem>>, vector<16x1xf32>
      %40 = arith.subf %38, %39 : vector<16x1xf32>
      %c0_25 = arith.constant 0 : index
      %c0_26 = arith.constant 0 : index
      %41 = vector.load %arg6[%c0_25, %c0_26] : memref<16x1xf32, #tpu.memory_space<vmem>>, vector<16x1xf32>
      %42 = math.log %41 : vector<16x1xf32>
      %43 = arith.subf %40, %42 : vector<16x1xf32>
      %cst_27 = arith.constant 0.699999988 : f32
      %44 = vector.broadcast %cst_27 : f32 to vector<16x1xf32>
      %45 = arith.mulf %44, %43 : vector<16x1xf32>
      %46 = math.exp %45 : vector<16x1xf32>
      %cst_28 = arith.constant 1.000000e+00 : f32
      %47 = vector.broadcast %cst_28 : f32 to vector<16x1xf32>
      %48 = arith.subf %47, %46 : vector<16x1xf32>
      %cst_29 = arith.constant 1.42857146 : f32
      %49 = vector.broadcast %cst_29 : f32 to vector<16x1xf32>
      %50 = arith.mulf %48, %49 : vector<16x1xf32>
      %51 = vector.shape_cast %50 : vector<16x1xf32> to vector<1x1x16xf32>
      %c0_30 = arith.constant 0 : index
      %c0_31 = arith.constant 0 : index
      %c0_32 = arith.constant 0 : index
      %52 = vector.load %arg4[%c0_30, %c0_31, %c0_32] : memref<1x1x16xf32, #tpu.memory_space<vmem>>, vector<1x1x16xf32>
      tpu.vector_store %arg4[%c0_30, %c0_31, %c0_32], %51 {strides = array<i32>} : memref<1x1x16xf32, #tpu.memory_space<vmem>>, vector<1x1x16xf32>,
    } else {
    }
    return
  }
  func.func @transform_0(%arg0: i32, %arg1: i32) -> (i32, i32) {
    %c0_i32 = arith.constant 0 : i32
    return %arg0, %arg1 : i32, i32
  }
  func.func @transform_1(%arg0: i32, %arg1: i32) -> (i32, i32) {
    %c0_i32 = arith.constant 0 : i32
    %c0_i32_0 = arith.constant 0 : i32
    return %arg0, %c0_i32 : i32, i32
  }
  func.func @transform_2(%arg0: i32, %arg1: i32) -> (i32, i32, i32) {
    %c0_i32 = arith.constant 0 : i32
    %c0_i32_0 = arith.constant 0 : i32
    %c0_i32_1 = arith.constant 0 : i32
    return %arg0, %c0_i32, %c0_i32_0 : i32, i32, i32
  }
}

</mosaic_0001>

<bundles_post_ra>
// kernel: tpu_custom_call.1
= control target key start
LH: loop header
LB: loop body
LE: loop exit
PB: predicated region body
PF: predicated region fallthrough
CT: control target
= control target key end

     0   :  { %vm34_vm0 = vcmask 261120   ;;  %v213_v3 = vmov 0   ;;  %s282_s0 = inlined_call_operand.vmem [shape: f32[8,32], index: 0, kind: input, shape index: {}]   ;;  %s283_s1 = inlined_call_operand.vmem [shape: s32[8,1], index: 1, kind: input, shape index: {}]   ;;  %s284_s2 = inlined_call_operand.hbm [shape: f32[1,1,16], index: 2, kind: output, shape index: {}]  }
   0x1   :  { %v23_v0 = vld [vmem:[%s282_s0] sm:$0xff]  ;;  %v24_v1 = vld [vmem:[%s282_s0 + $0x8] sm:$0xff]  ;;  %172 = vset.pattern.permute.xlu0 %v213_v3  ;;  %171 = vset.pattern.permute.xlu1 %v213_v3 }
   0x2   :  { %v35_v2 = vsel %vm34_vm0, %v23_v0, -inf }
   0x3   :  { %7 = vsyncpa [#allocation6], 0  ;;  %36 = vmax.xlane.f32.xlu0 %v35_v2  ;;  %v38_v4 = vsel %vm34_vm0, %v24_v1, -inf  ;;  %vm16_vm1 = vcmask 7168   ;;  %v214_v5 = vmov -inf   ;;  %v25_v6 = vld [vmem:[%s283_s1] sm:$0xff]  ;;  %v28_v15 = vlaneseq }
   0x4   :  { %17 = vst.msk [vmem:[#allocation2] sm:$0xff] %vm16_vm1, %v214_v5  ;;  %18 = vst.msk [vmem:[#allocation2 + $0x8] sm:$0xff] %vm16_vm1, %v214_v5  ;;  %v215_v7 = vmov 0.0   ;;  %v26_v17 = vld [vmem:[%s283_s1 + $0x8] sm:$0xff]  ;;  %s216_s1 = smov [#allocation5]   ;;  %vm148_vm4 = vcmask 130112  }
   0x5   :  { %21 = vst.msk [vmem:[#allocation4] sm:$0xff] %vm16_vm1, %v215_v7  ;;  %19 = vst.msk [vmem:[#allocation3] sm:$0xff] %vm16_vm1, %v215_v7  ;;  %v255_v18 = vand.u32 127, %v28_v15  ;;  %s159_s16 = sshll.u32 %s216_s1, 4  ;;  %vm151_vm5 = vcmask 122880   ;;  %s160_s16 = int_to_ptr.vmem [resolvable:$true] %s159_s16 }
   0x6   :  { %20 = vst.msk [vmem:[#allocation3 + $0x8] sm:$0xff] %vm16_vm1, %v215_v7  ;;  %22 = vst.msk [vmem:[#allocation4 + $0x8] sm:$0xff] %vm16_vm1, %v215_v7  ;;  %s189_s17 = scalar_lea.vmem %s160_s16, 16  ;;  %s193_s18 = scalar_lea.vmem %s160_s16, 32 }
   0x7   :  { %39 = vmax.xlane.f32.xlu0 %v38_v4  ;;  %p190_p0 = scmp.ne.s32.totalorder %s160_s16, %s189_s17  ;;  %p194_p1 = scmp.lt.s32.totalorder %s160_s16, %s160_s16 }
   0x8   :  { %p195_p2 = scmp.lt.s32.totalorder %s193_s18, %s189_s17 }
   0xa   :  { %p196_p3 = por %p195_p2, %p194_p1 }
   0xb   :  { %v32_v8 = vld [vmem:[#allocation2] sm:$0xff]  ;;  %v33_v11 = vld [vmem:[#allocation2 + $0x8] sm:$0xff] }
   0xc   :  { %v90_v35 = vld [vmem:[#allocation4] sm:$0xff]  ;;  %v43_v41 = vld [vmem:[#allocation3] sm:$0xff]  ;;  %p197_p4 = pnand %p196_p3, %p190_p0 }
   0xd   :  { %v44_v45 = vld [vmem:[#allocation3 + $0x8] sm:$0xff]  ;;  %v91_v50 = vld [vmem:[#allocation4 + $0x8] sm:$0xff] }
  0x1d   :  { %81 = vperm.xlu0 %172, %v25_v6  }
  0x90   :  { %v37_v9 = vpop.xlane.xlu0 %36 }
  0x91   :  { %v41_v10 = vmax.f32 %v32_v8, %v37_v9 }
  0x93   :  { %v45_v12 = vsub.f32 %v32_v8, %v41_v10  ;;  %102 = vst.msk [vmem:[#allocation2] sm:$0xff] %vm16_vm1, %v41_v10  ;;  %55 = vperm.xlu1 %171, %v41_v10  }
  0x94   :  { %v40_v13 = vpop.xlane.xlu0 %39 }
  0x95   :  { %v42_v14 = vmax.f32 %v33_v11, %v40_v13  ;;  %v47_v38 = vmul.f32 1.442695, %v45_v12  ;;  %v140_v13 = vshrl.u32 %v28_v15, 7 }
  0x97   :  { %v46_v16 = vsub.f32 %v33_v11, %v42_v14  ;;  %103 = vst.msk [vmem:[#allocation2 + $0x8] sm:$0xff] %vm16_vm1, %v42_v14  ;;  %60 = vperm.xlu1 %171, %v42_v14   ;;  %v143_v14 = vadd.s32 4294967288, %v255_v18 }
  0x99   :  { %v49_v39 = vmul.f32 1.442695, %v46_v16 }
  0x9a   :  { %v109_v57 = vld [vmem:[#allocation2] sm:$0xff] }
  0x9b   :  { %84 = vperm.xlu1 %171, %v26_v17   ;;  %v141_v17 = vsub.s32 %v255_v18, %v140_v13 }
  0x9c   :  { %v82_v19 = vpop.permute.xlu0 %81 }
  0x9d   :  { %vm86_vm2 = vcmp.eq.s32.totalorder %v255_v18, %v82_v19  ;;  %v146_v19 = vsub.s32 %v143_v14, %v140_v13 }
  0x9e   :  { %v88_v20 = vsel %vm86_vm2, %v23_v0, 0.0  ;;  %v110_v63 = vld [vmem:[#allocation2 + $0x8] sm:$0xff] }
  0x9f   :  { %v92_v21 = vsel %vm34_vm0, %v88_v20, 0.0 }
  0xa0   :  { %93 = vadd.xlane.f32.xlu0 %v92_v21 }
 0x112   :  { %v56_v22 = vpop.permute.xlu1 %55 }
 0x113   :  { %v63_v23 = vsub.f32 %v23_v0, %v56_v22 }
 0x115   :  { %v65_v24 = vmul.f32 1.442695, %v63_v23 }
 0x116   :  { %v61_v25 = vpop.permute.xlu1 %60 }
 0x117   :  { %173 = vpow2.f32 %v65_v24  ;;  %v64_v26 = vsub.f32 %v24_v1, %v61_v25 }
 0x119   :  { %v67_v27 = vmul.f32 1.442695, %v64_v26 }
 0x11a   :  { %v85_v29 = vpop.permute.xlu1 %84 }
 0x11b   :  { %175 = vpow2.f32 %v67_v27  ;;  %vm87_vm3 = vcmp.eq.s32.totalorder %v255_v18, %v85_v29 }
 0x11c   :  { %v89_v33 = vsel %vm87_vm3, %v24_v1, 0.0  ;;  %177 = vpow2.f32 %v47_v38 }
 0x11d   :  { %v95_v34 = vsel %vm34_vm0, %v89_v33, 0.0  ;;  %179 = vpow2.f32 %v49_v39 }
 0x121   :  { %v174_v28 = vpop.eup %173 }
 0x122   :  { %v69_v30 = vsel %vm34_vm0, %v174_v28, 0.0 }
 0x123   :  { %70 = vadd.xlane.f32.xlu1 %v69_v30 }
 0x125   :  { %v176_v31 = vpop.eup %175 }
 0x126   :  { %v72_v32 = vsel %vm34_vm0, %v176_v31, 0.0  ;;  %v178_v40 = vpop.eup %177 }
 0x127   :  { %73 = vadd.xlane.f32.xlu1 %v72_v32  ;;  %v51_v42 = vmul.f32 %v178_v40, %v43_v41  ;;  %v180_v43 = vpop.eup %179 }
 0x128   :  { %v52_v47 = vmul.f32 %v180_v43, %v44_v45 }
 0x12b   :  { %96 = vadd.xlane.f32.xlu1 %v95_v34 }
 0x12d   :  { %v94_v36 = vpop.xlane.xlu0 %93 }
 0x12e   :  { %v98_v37 = vadd.f32 %v94_v36, %v90_v35 }
 0x130   :  { %100 = vst.msk [vmem:[#allocation4] sm:$0xff] %vm16_vm1, %v98_v37 }
 0x137   :  { %v107_v55 = vld [vmem:[#allocation4] sm:$0xff] }
 0x138   :  { %v111_v58 = vsub.f32 %v107_v55, %v109_v57 }
 0x1b0   :  { %v71_v44 = vpop.xlane.xlu1 %70 }
 0x1b1   :  { %v75_v46 = vadd.f32 %v71_v44, %v51_v42 }
 0x1b3   :  { %78 = vst.msk [vmem:[#allocation3] sm:$0xff] %vm16_vm1, %v75_v46 }
 0x1b4   :  { %v74_v48 = vpop.xlane.xlu1 %73 }
 0x1b5   :  { %v76_v49 = vadd.f32 %v74_v48, %v52_v47 }
 0x1b7   :  { %79 = vst.msk [vmem:[#allocation3 + $0x8] sm:$0xff] %vm16_vm1, %v76_v49 }
 0x1b8   :  { %v97_v51 = vpop.xlane.xlu1 %96 }
 0x1b9   :  { %v99_v52 = vadd.f32 %v97_v51, %v91_v50 }
 0x1ba   :  { %v113_v53 = vld [vmem:[#allocation3] sm:$0xff] }
 0x1bb   :  { %101 = vst.msk [vmem:[#allocation4 + $0x8] sm:$0xff] %vm16_vm1, %v99_v52  ;;  %181 = vlog2.f32 %v113_v53 }
 0x1be   :  { %v114_v54 = vld [vmem:[#allocation3 + $0x8] sm:$0xff] }
 0x1bf   :  { %183 = vlog2.f32 %v114_v54 }
 0x1c2   :  { %v108_v60 = vld [vmem:[#allocation4 + $0x8] sm:$0xff] }
 0x1c3   :  { %v112_v1 = vsub.f32 %v108_v60, %v110_v63 }
 0x1c5   :  { %v182_v56 = vpop.eup %181 }
 0x1c6   :  { %v116_v59 = vmul.f32 0.6931472, %v182_v56 }
 0x1c8   :  { %v119_v61 = vsub.f32 %v111_v58, %v116_v59 }
 0x1c9   :  { %v184_v62 = vpop.eup %183 }
 0x1ca   :  { %v121_v0 = vmul.f32 0.7, %v119_v61  ;;  %v118_v2 = vmul.f32 0.6931472, %v184_v62 }
 0x1cc   :  { %v123_v3 = vmul.f32 1.442695, %v121_v0  ;;  %v120_v4 = vsub.f32 %v112_v1, %v118_v2 }
 0x1ce   :  { %185 = vpow2.f32 %v123_v3  ;;  %v122_v5 = vmul.f32 0.7, %v120_v4 }
 0x1d0   :  { %v125_v6 = vmul.f32 1.442695, %v122_v5 }
 0x1d2   :  { %187 = vpow2.f32 %v125_v6 }
 0x1d8   :  { %v186_v7 = vpop.eup %185 }
 0x1d9   :  { %v127_v8 = vsub.f32 1.0, %v186_v7 }
 0x1db   :  { %v129_v9 = vmul.f32 1.4285715, %v127_v8 }
 0x1dc   :  { %v188_v10 = vpop.eup %187 }
 0x1dd   :  { %134 = vperm.xlu1 %171, %v129_v9   ;;  %v128_v11 = vsub.f32 1.0, %v188_v10 }
 0x1df   :  { %v130_v12 = vmul.f32 1.4285715, %v128_v11 }
 0x1e1   :  { %137 = vperm.xlu1 %171, %v130_v12  }
 0x25c   :  { %v135_v16 = vpop.permute.xlu1 %134 }
 0x25d   :  { %v142_v21 = vrot.slane %v135_v16, %v141_v17 }
 0x260   :  { %v138_v20 = vpop.permute.xlu1 %137 }
 0x261   :  { %v147_v22 = vrot.slane %v138_v20, %v146_v19 }
 0x263   :  { %v149_v23 = vsel %vm148_vm4, %v147_v22, %v142_v21 }
 0x264   :  { %152 = vst.msk [vmem:[#allocation5] sm:$0x1] %vm151_vm5, %v149_v23 }
 0x265   :  { %200 = shalt.err (!%p197_p4)
}
 0x266   :  { %s201_s21 = scalar_lea.hbm %s284_s2, 16 }
 0x267   :  { %p202_p5 = scmp.ne.s32.totalorder %s284_s2, %s201_s21  ;;  %p205_p6 = scmp.lt.u32.totalorder %s201_s21, %s284_s2 }
 0x269   :  { %p207_p7 = pnand %p205_p6, %p202_p5 }
 0x26b   :  { %210 = shalt.err (!%p207_p7)
}
 0x26c   :  { %162 = dma.vmem_to_hbm [thread:$0]  %s160_s16, 16, %s284_s2, [#allocation6]  }
 0x26d   :  { %211 = dma.done.wait [#allocation6], 16  }
 0x26e   :  { %212 = vsyncadd [#allocation6], 4294967280 }
 0x26f   :  { %166 = vsyncpa [#allocation6], 1 }

</bundles_post_ra>
